<compile_context>
chip_gen: v7x
topology: tpu7x:2x2x1
jax: 0.10.0
libtpu: 0.0.40
codegen_flags: <defaults>
</compile_context>

<pallas_src>
import functools

import jax
import jax.numpy as jnp
from jax.experimental import pallas as pl
from jax.experimental.pallas import tpu as pltpu

# Model dims (from the PyTorch module).
OBS_DIM = 339
X3_DIM = 822 - 800          # 22
H1 = 800
H2 = 500
OUT = 1

# Zero-padded, tile-aligned dims (zero padding keeps the math identical).
OBS_PAD = 384               # 339 -> 3 * 128
H1_PAD = 896                # 800 -> 7 * 128
X3_PAD = 128                # 22  -> 1 * 128


def _round_up(x, m):
    return (x + m - 1) // m * m


def q_network_kernel(obs_ref, x3_ref, w1_ref, b1_ref,
                     w23a_ref, w23b_ref, b23_ref, out_ref):
    # dense1: bf16 x bf16 on the MXU, f32 accumulate; bias + ReLU in f32 (VPU).
    h1 = jnp.dot(obs_ref[...], w1_ref[...], preferred_element_type=jnp.float32)
    h1 = jnp.maximum(h1 + b1_ref[...], 0.0)

    # dense2 and dense3 folded (no nonlinearity between them in the module):
    #   cat(h1, x3) @ W2^T @ W3^T + (b2 @ W3^T + b3)
    # With N=1 an MXU matmul wastes >= 127/128 of every output tile, so this
    # is a VPU multiply + lane (XLU) reduction against lane-dense row weights.
    s1 = jnp.sum(h1 * w23a_ref[...], axis=-1, keepdims=True)            # (tb, 1)
    s2 = jnp.sum(x3_ref[...] * w23b_ref[...], axis=-1, keepdims=True)   # (tb, 1)
    col = s1 + s2 + b23_ref[...]                                        # (tb, 1)

    # Lane-dense store: (tb, 1) -> (1, tb) (cheap XLU relayout) so the output
    # tile is written with unmasked full-lane stores.
    out_ref[...] = col.T[None].astype(out_ref.dtype)                    # (1, 1, tb)


def prepare_params(params, weight_dtype=jnp.bfloat16):
    """One-time weight prep (fold dense2/dense3, transpose, pad, cast).

    Call this OUTSIDE the hot path; the result is what q_network_forward takes.
    """
    w1, b1, w2, b2, w3, b3 = (params[k] for k in ("w1", "b1", "w2", "b2", "w3", "b3"))
    w1_t = w1.T.astype(jnp.float32)              # (339, 800)
    w2_t = w2.T.astype(jnp.float32)              # (822, 500)
    w3_t = w3.T.astype(jnp.float32)              # (500, 1)

    # Fold dense2/dense3 in f32.
    w23 = w2_t @ w3_t                            # (822, 1)
    b23 = (b2 @ w3_t + b3).reshape(1, OUT)       # (1, 1)
    w23a = w23[:H1].reshape(1, H1)               # (1, 800)  pairs with h1
    w23b = w23[H1:].reshape(1, X3_DIM)           # (1, 22)   pairs with x3

    # Zero-pad to tile-exact shapes (row-vector layout => lane-dense in VMEM).
    w1_p = jnp.pad(w1_t, ((0, OBS_PAD - OBS_DIM), (0, H1_PAD - H1))).astype(weight_dtype)
    b1_p = jnp.pad(b1.reshape(1, H1).astype(jnp.float32), ((0, 0), (0, H1_PAD - H1)))
    w23a_p = jnp.pad(w23a, ((0, 0), (0, H1_PAD - H1))).astype(jnp.float32)
    w23b_p = jnp.pad(w23b, ((0, 0), (0, X3_PAD - X3_DIM))).astype(jnp.float32)
    return (w1_p, b1_p, w23a_p, w23b_p, b23.astype(jnp.float32))


@functools.partial(jax.jit, static_argnames=("block_b",))
def q_network_forward(obs, x3, packed, *, block_b=512):
    w1_p, b1_p, w23a_p, w23b_p, b23 = packed
    obs = jnp.asarray(obs, jnp.float32)
    x3 = jnp.asarray(x3, jnp.float32)
    if obs.ndim < 2:
        obs = obs[None, :]
    if x3.ndim < 2:
        x3 = x3[None, :]
    B = obs.shape[0]

    # Batch tiling. Tiles are multiples of 16 rows (obs is bf16: 16 rows pack
    # one vreg sublane-group); a user-supplied block_b is defensively rounded.
    # If the batch needs more than one tile, aim for >= 2 tiles so the
    # "parallel" grid axis shards across both v7x TensorCores (no-op on
    # single-TC v5e/v6e).
    block_b = max(16, _round_up(block_b, 16))
    b16 = _round_up(B, 16)
    if b16 <= 16:
        tb = 16
    else:
        tb = min(block_b, _round_up(b16 // 2, 16))
    bp = _round_up(B, tb)
    n_tiles = bp // tb

    obs_p = jnp.pad(obs, ((0, bp - B), (0, OBS_PAD - OBS_DIM))).astype(w1_p.dtype)
    x3_p = jnp.pad(x3, ((0, bp - B), (0, X3_PAD - X3_DIM)))

    bcast = lambda i: (0, 0)     # weights stay VMEM-resident across batch tiles
    batched = lambda i: (i, 0)

    flops = 2 * bp * OBS_PAD * H1_PAD + 2 * bp * (H1_PAD + X3_PAD)
    bytes_accessed = int(
        obs_p.size * obs_p.dtype.itemsize + x3_p.size * 4
        + w1_p.size * w1_p.dtype.itemsize + b1_p.size * 4
        + w23a_p.size * 4 + w23b_p.size * 4 + b23.size * 4 + bp * 4)

    # TODO(synk): if the production pattern is B=1..8 per call, the call is
    # bound by the ~672 KiB W1 DMA + fixed pallas_call cost; only cross-call
    # weight residency (prefetch future) or batching multiple states fixes that.
    out = pl.pallas_call(
        q_network_kernel,
        out_shape=jax.ShapeDtypeStruct((n_tiles, 1, tb), jnp.float32),
        grid=(n_tiles,),
        in_specs=[
            pl.BlockSpec((tb, OBS_PAD), batched),
            pl.BlockSpec((tb, X3_PAD), batched),
            pl.BlockSpec((OBS_PAD, H1_PAD), bcast),
            pl.BlockSpec((1, H1_PAD), bcast),
            pl.BlockSpec((1, H1_PAD), bcast),
            pl.BlockSpec((1, X3_PAD), bcast),
            pl.BlockSpec((1, 1), bcast),
        ],
        out_specs=pl.BlockSpec((1, 1, tb), lambda i: (i, 0, 0)),
        compiler_params=pltpu.CompilerParams(dimension_semantics=("parallel",)),
        cost_estimate=pl.CostEstimate(flops=flops, transcendentals=0,
                                      bytes_accessed=bytes_accessed),
    )(obs_p, x3_p, w1_p, b1_p, w23a_p, w23b_p, b23)
    return out.reshape(bp)[:B].reshape(B, OUT)


def init_params(key):
    """PyTorch nn.Linear default init: U(-1/sqrt(fan_in), 1/sqrt(fan_in))."""
    ks = jax.random.split(key, 6)

    def lin(kw, kb, fan_in, fan_out):
        bound = 1.0 / jnp.sqrt(fan_in)
        w = jax.random.uniform(kw, (fan_out, fan_in), jnp.float32, -bound, bound)
        b = jax.random.uniform(kb, (fan_out,), jnp.float32, -bound, bound)
        return w, b

    w1, b1 = lin(ks[0], ks[1], OBS_DIM, H1)
    w2, b2 = lin(ks[2], ks[3], H1 + X3_DIM, H2)
    w3, b3 = lin(ks[4], ks[5], H2, OUT)
    return dict(w1=w1, b1=b1, w2=w2, b2=b2, w3=w3, b3=b3)


def reference_forward(obs, x3, p):
    """Exact PyTorch semantics in f32 (unfused, with the concat)."""
    h1 = jnp.maximum(obs @ p["w1"].T + p["b1"], 0.0)
    x = jnp.concatenate([h1, x3], axis=1)
    x = x @ p["w2"].T + p["b2"]
    return x @ p["w3"].T + p["b3"]


def reference_forward_bf16w(obs, x3, p):
    """Same math but with obs/W1 quantized to bf16 like the kernel's MXU inputs."""
    obs_q = obs.astype(jnp.bfloat16).astype(jnp.float32)
    w1_q = p["w1"].astype(jnp.bfloat16).astype(jnp.float32)
    h1 = jnp.maximum(obs_q @ w1_q.T + p["b1"], 0.0)
    x = jnp.concatenate([h1, x3], axis=1)
    x = x @ p["w2"].T + p["b2"]
    return x @ p["w3"].T + p["b3"]


if __name__ == "__main__":
    key = jax.random.PRNGKey(0)
    kp, ko, kx = jax.random.split(key, 3)

    params = init_params(kp)
    packed = prepare_params(params)           # bf16 W1, folded dense2/dense3

    # Small demo batch (matches the module's typical single/few-state calls).
    B = 2
    obs = jax.random.normal(ko, (B, OBS_DIM), jnp.float32)
    x3 = jax.random.normal(kx, (B, X3_DIM), jnp.float32)

    out = jax.block_until_ready(q_network_forward(obs, x3, packed))
    assert out.shape == (B, OUT)

    ref_q = reference_forward_bf16w(obs, x3, params)   # same bf16 quantization
    ref_f = reference_forward(obs, x3, params)         # full-f32 module semantics
    assert jnp.allclose(out, ref_q, atol=2e-3, rtol=2e-3), (out, ref_q)
    assert jnp.allclose(out, ref_f, atol=2e-2, rtol=2e-2), (out, ref_f)

    # Multi-tile batch grid with the default tile (B=300 -> 2 tiles of 160,
    # exercising padding + the >=2-tile split for v7x).
    B2 = 300
    obs2 = jax.random.normal(ko, (B2, OBS_DIM), jnp.float32)
    x32 = jax.random.normal(kx, (B2, X3_DIM), jnp.float32)
    out2 = jax.block_until_ready(q_network_forward(obs2, x32, packed))
    ref2 = reference_forward_bf16w(obs2, x32, params)
    assert out2.shape == (B2, OUT)
    assert jnp.allclose(out2, ref2, atol=2e-3, rtol=2e-3)

    # Also exercise a user-supplied (odd-count) tile: 3 tiles of 128.
    out3 = jax.block_until_ready(q_network_forward(obs2, x32, packed, block_b=128))
    assert out3.shape == (B2, OUT)
    assert jnp.allclose(out3, ref2, atol=2e-3, rtol=2e-3)

    print("KERNEL_OK")
</pallas_src>

<mosaic_0001>
module attributes {stable_mosaic.version = 11 : i64} {
  func.func @q_network_kernel(%arg0: i32, %arg1: memref<16x384xbf16, #tpu.memory_space<vmem>>, %arg2: memref<16x128xf32, #tpu.memory_space<vmem>>, %arg3: memref<384x896xbf16, #tpu.memory_space<vmem>>, %arg4: memref<1x896xf32, #tpu.memory_space<vmem>>, %arg5: memref<1x896xf32, #tpu.memory_space<vmem>>, %arg6: memref<1x128xf32, #tpu.memory_space<vmem>>, %arg7: memref<1x1xf32, #tpu.memory_space<vmem>>, %arg8: memref<1x1x16xf32, #tpu.memory_space<vmem>>) attributes {dimension_semantics = [#tpu.dimension_semantics<parallel>], iteration_bounds = array<i64: 1>, scalar_prefetch = 0 : i64, scratch_operands = 0 : i64, tpu.core_type = #tpu.core_type<tc>, window_params = [{transform_indices = @transform_0, window_bounds = array<i64: 16, 384>}, {transform_indices = @transform_1, window_bounds = array<i64: 16, 128>}, {pipeline_mode = #tpu.pipeline_mode<synchronous>, transform_indices = @transform_2, window_bounds = array<i64: 384, 896>}, {pipeline_mode = #tpu.pipeline_mode<synchronous>, transform_indices = @transform_3, window_bounds = array<i64: 1, 896>}, {pipeline_mode = #tpu.pipeline_mode<synchronous>, transform_indices = @transform_4, window_bounds = array<i64: 1, 896>}, {pipeline_mode = #tpu.pipeline_mode<synchronous>, transform_indices = @transform_5, window_bounds = array<i64: 1, 128>}, {pipeline_mode = #tpu.pipeline_mode<synchronous>, transform_indices = @transform_6, window_bounds = array<i64: 1, 1>}, {transform_indices = @transform_7, window_bounds = array<i64: 1, 1, 16>}]} {
    %c0 = arith.constant 0 : index
    %c0_0 = arith.constant 0 : index
    %0 = vector.load %arg1[%c0, %c0_0] : memref<16x384xbf16, #tpu.memory_space<vmem>>, vector<16x384xbf16>
    %c0_1 = arith.constant 0 : index
    %c0_2 = arith.constant 0 : index
    %1 = vector.load %arg3[%c0_1, %c0_2] : memref<384x896xbf16, #tpu.memory_space<vmem>>, vector<384x896xbf16>
    %cst = arith.constant dense<0.000000e+00> : vector<16x896xf32>
    %2 = tpu.matmul %0, %1, %cst {dimension_numbers = #tpu.dot_dimension_numbers<[1], [0], [0], [1], [0, 0, 1, 1], [], []>} : vector<16x384xbf16>, vector<384x896xbf16>, vector<16x896xf32> -> vector<16x896xf32>
    %c0_3 = arith.constant 0 : index
    %c0_4 = arith.constant 0 : index
    %3 = vector.load %arg4[%c0_3, %c0_4] : memref<1x896xf32, #tpu.memory_space<vmem>>, vector<1x896xf32>
    %4 = vector.broadcast %3 : vector<1x896xf32> to vector<16x896xf32>
    %5 = arith.addf %2, %4 : vector<16x896xf32>
    %cst_5 = arith.constant 0.000000e+00 : f32
    %6 = vector.broadcast %cst_5 : f32 to vector<16x896xf32>
    %7 = arith.maximumf %5, %6 : vector<16x896xf32>
    %c0_6 = arith.constant 0 : index
    %c0_7 = arith.constant 0 : index
    %8 = vector.load %arg5[%c0_6, %c0_7] : memref<1x896xf32, #tpu.memory_space<vmem>>, vector<1x896xf32>
    %9 = vector.broadcast %8 : vector<1x896xf32> to vector<16x896xf32>
    %10 = arith.mulf %7, %9 : vector<16x896xf32>
    %cst_8 = arith.constant dense<0.000000e+00> : vector<16xf32>
    %11 = vector.multi_reduction <add>, %10, %cst_8 [1] : vector<16x896xf32> to vector<16xf32>
    %12 = vector.shape_cast %11 : vector<16xf32> to vector<16x1xf32>
    %c0_9 = arith.constant 0 : index
    %c0_10 = arith.constant 0 : index
    %13 = vector.load %arg2[%c0_9, %c0_10] : memref<16x128xf32, #tpu.memory_space<vmem>>, vector<16x128xf32>
    %c0_11 = arith.constant 0 : index
    %c0_12 = arith.constant 0 : index
    %14 = vector.load %arg6[%c0_11, %c0_12] : memref<1x128xf32, #tpu.memory_space<vmem>>, vector<1x128xf32>
    %15 = vector.broadcast %14 : vector<1x128xf32> to vector<16x128xf32>
    %16 = arith.mulf %13, %15 : vector<16x128xf32>
    %cst_13 = arith.constant dense<0.000000e+00> : vector<16xf32>
    %17 = vector.multi_reduction <add>, %16, %cst_13 [1] : vector<16x128xf32> to vector<16xf32>
    %18 = vector.shape_cast %17 : vector<16xf32> to vector<16x1xf32>
    %19 = arith.addf %12, %18 : vector<16x1xf32>
    %c0_14 = arith.constant 0 : index
    %c0_15 = arith.constant 0 : index
    %20 = vector.load %arg7[%c0_14, %c0_15] : memref<1x1xf32, #tpu.memory_space<vmem>>, vector<1x1xf32>
    %21 = vector.broadcast %20 : vector<1x1xf32> to vector<16x1xf32>
    %22 = arith.addf %19, %21 : vector<16x1xf32>
    %23 = tpu.transpose %22, [1, 0] : vector<16x1xf32> -> vector<1x16xf32>
    %24 = vector.shape_cast %23 : vector<1x16xf32> to vector<1x1x16xf32>
    %c0_16 = arith.constant 0 : index
    %c0_17 = arith.constant 0 : index
    %c0_18 = arith.constant 0 : index
    %25 = vector.load %arg8[%c0_16, %c0_17, %c0_18] : memref<1x1x16xf32, #tpu.memory_space<vmem>>, vector<1x1x16xf32>
    tpu.vector_store %arg8[%c0_16, %c0_17, %c0_18], %24 {strides = array<i32>} : memref<1x1x16xf32, #tpu.memory_space<vmem>>, vector<1x1x16xf32>,
    return
  }
  func.func @transform_0(%arg0: i32) -> (i32, i32) {
    %c0_i32 = arith.constant 0 : i32
    %c0_i32_0 = arith.constant 0 : i32
    return %arg0, %c0_i32 : i32, i32
  }
  func.func @transform_1(%arg0: i32) -> (i32, i32) {
    %c0_i32 = arith.constant 0 : i32
    %c0_i32_0 = arith.constant 0 : i32
    return %arg0, %c0_i32 : i32, i32
  }
  func.func @transform_2(%arg0: i32) -> (i32, i32) {
    %c0_i32 = arith.constant 0 : i32
    %c0_i32_0 = arith.constant 0 : i32
    %c0_i32_1 = arith.constant 0 : i32
    return %c0_i32, %c0_i32_0 : i32, i32
  }
  func.func @transform_3(%arg0: i32) -> (i32, i32) {
    %c0_i32 = arith.constant 0 : i32
    %c0_i32_0 = arith.constant 0 : i32
    %c0_i32_1 = arith.constant 0 : i32
    return %c0_i32, %c0_i32_0 : i32, i32
  }
  func.func @transform_4(%arg0: i32) -> (i32, i32) {
    %c0_i32 = arith.constant 0 : i32
    %c0_i32_0 = arith.constant 0 : i32
    %c0_i32_1 = arith.constant 0 : i32
    return %c0_i32, %c0_i32_0 : i32, i32
  }
  func.func @transform_5(%arg0: i32) -> (i32, i32) {
    %c0_i32 = arith.constant 0 : i32
    %c0_i32_0 = arith.constant 0 : i32
    %c0_i32_1 = arith.constant 0 : i32
    return %c0_i32, %c0_i32_0 : i32, i32
  }
  func.func @transform_6(%arg0: i32) -> (i32, i32) {
    %c0_i32 = arith.constant 0 : i32
    %c0_i32_0 = arith.constant 0 : i32
    %c0_i32_1 = arith.constant 0 : i32
    return %c0_i32, %c0_i32_0 : i32, i32
  }
  func.func @transform_7(%arg0: i32) -> (i32, i32, i32) {
    %c0_i32 = arith.constant 0 : i32
    %c0_i32_0 = arith.constant 0 : i32
    %c0_i32_1 = arith.constant 0 : i32
    return %arg0, %c0_i32, %c0_i32_0 : i32, i32, i32
  }
}

</mosaic_0001>

<bundles_post_ra>
// kernel: q_network_forward.1
= control target key start
LH: loop header
LB: loop body
LE: loop exit
PB: predicated region body
PF: predicated region fallthrough
CT: control target
= control target key end

     0   :  { %s2300_s0 = inlined_call_operand.vmem [shape: bf16[16,384], index: 0, kind: input, shape index: {}]   ;;  %s2301_s1 = inlined_call_operand.vmem [shape: f32[16,128], index: 1, kind: input, shape index: {}]   ;;  %s2302_s2 = inlined_call_operand.hbm [shape: bf16[384,896], index: 2, kind: input, shape index: {}]   ;;  %s2303_s3 = inlined_call_operand.vmem [shape: f32[1,896], index: 3, kind: input, shape index: {}]   ;;  %s2304_s4 = inlined_call_operand.vmem [shape: f32[1,896], index: 4, kind: input, shape index: {}]   ;;  %s2305_s5 = inlined_call_operand.vmem [shape: f32[1,128], index: 5, kind: input, shape index: {}]   ;;  %s2306_s6 = inlined_call_operand.<no memory space> [shape: f32[1,1], index: 6, kind: input, shape index: {}]   ;;  %s2307_s7 = inlined_call_operand.vmem [shape: f32[1,1,16], index: 7, kind: output, shape index: {}]  }
   0x1   :  { %v12_v0 = vstv %s2306_s6 }
   0x2   :  { %13 = vst [vmem:[#allocation2] sm:$0x1] %v12_v0 }
   0x3   :  { %14 = vsyncpa [#allocation4], 0  ;;  %s2164_s26 = smov [#allocation3]   ;;  %s2140_s30 = scalar_lea.hbm %s2302_s2, 21504 }
   0x4   :  { %s24_s27 = sshll.u32 %s2164_s26, 4  ;;  %p2141_p0 = scmp.ne.s32.totalorder %s2302_s2, %s2140_s30  ;;  %s25_s27 = int_to_ptr.vmem [resolvable:$true] %s24_s27 }
   0x5   :  { %p2144_p1 = scmp.lt.u32.totalorder %s2140_s30, %s2302_s2 }
   0x7   :  { %p2146_p2 = pnand %p2144_p1, %p2141_p0 }
   0x9   :  { %2149 = shalt.err (!%p2146_p2)
}
   0xa   :  { %s2150_s6 = scalar_lea.vmem %s25_s27, 21504  ;;  %p2155_p4 = scmp.lt.s32.totalorder %s25_s27, %s25_s27 }
   0xb   :  { %p2151_p3 = scmp.ne.s32.totalorder %s25_s27, %s2150_s6  ;;  %p2156_p5 = scmp.lt.s32.totalorder %s2150_s6, %s2150_s6 }
   0xd   :  { %p2157_p6 = por %p2156_p5, %p2155_p4 }
   0xf   :  { %p2158_p7 = pnand %p2157_p6, %p2151_p3 }
  0x11   :  { %2161 = shalt.err (!%p2158_p7)
}
  0x12   :  { %s2165_s12 = smov 448   ;;  %s2166_s13 = smov 28  }
  0x13   :  { %30 = dma.hbm_to_vmem [thread:$0]  %s2302_s2, 21504, %s25_s27, [#allocation4], %s2165_s12, %s2165_s12, %s2166_s13  }
  0x14   :  { %2162 = dma.done.wait [#allocation4], 21504  }
  0x15   :  { %2163 = vsyncadd [#allocation4], 4294945792  ;;  %v1896_v1 = vld [vmem:[#allocation3 + $0x4] ss:$28 sps:$4 sm:$0xff]   ;;  %v1899_v3 = vld [vmem:[#allocation3 + $0xc] ss:$28 sps:$4 sm:$0xff]  }
  0x16   :  { %v1898_v2 = vld [vmem:[#allocation3] ss:$28 sps:$4 sm:$0xff]   ;;  %1156 = vmatprep.subr.bf16.mxu0 %v1896_v1  ;;  %v1901_v4 = vld [vmem:[#allocation3 + $0x8] ss:$28 sps:$4 sm:$0xff]   ;;  %v1904_v6 = vld [vmem:[#allocation3 + $0x38] ss:$28 sps:$4 sm:$0xff]   ;;  %1242 = vmatprep.subr.bf16.mxu1 %v1899_v3 }
  0x17   :  { %1157 = vmatpush1.bf16.msra.mxu0 %v1898_v2  ;;  %v1902_v5 = vld [vmem:[#allocation3 + $0x3c] ss:$28 sps:$4 sm:$0xff]   ;;  %v1905_v7 = vld [vmem:[#allocation3 + $0x44] ss:$28 sps:$4 sm:$0xff]   ;;  %1243 = vmatpush1.bf16.msra.mxu1 %v1901_v4  ;;  %v1908_v9 = vld [vmem:[#allocation3 + $0x74] ss:$28 sps:$4 sm:$0xff]  }
  0x18   :  { %1158 = vmatprep.subr.bf16.mxu0 %v1902_v5  ;;  %v1907_v8 = vld [vmem:[#allocation3 + $0x40] ss:$28 sps:$4 sm:$0xff]   ;;  %1244 = vmatprep.subr.bf16.mxu1 %v1905_v7  ;;  %v1910_v10 = vld [vmem:[#allocation3 + $0x70] ss:$28 sps:$4 sm:$0xff]   ;;  %v1913_v13 = vld [vmem:[#allocation3 + $0x78] ss:$28 sps:$4 sm:$0xff]  }
  0x19   :  { %v1911_v11 = vld [vmem:[#allocation3 + $0x7c] ss:$28 sps:$4 sm:$0xff]   ;;  %v1914_v12 = vld [vmem:[#allocation3 + $0xac] ss:$28 sps:$4 sm:$0xff]   ;;  %v1917_v14 = vld [vmem:[#allocation3 + $0xb4] ss:$28 sps:$4 sm:$0xff]  }
  0x1a   :  { %v1916_v15 = vld [vmem:[#allocation3 + $0xa8] ss:$28 sps:$4 sm:$0xff]   ;;  %v1919_v17 = vld [vmem:[#allocation3 + $0xb0] ss:$28 sps:$4 sm:$0xff]   ;;  %v1922_v19 = vld [vmem:[#allocation3 + $0xe0] ss:$28 sps:$4 sm:$0xff]  }
  0x1b   :  { %1159 = vmatpush1.bf16.msra.mxu0 %v1904_v6  ;;  %1245 = vmatpush1.bf16.msra.mxu1 %v1907_v8  ;;  %v1920_v16 = vld [vmem:[#allocation3 + $0xe4] ss:$28 sps:$4 sm:$0xff]   ;;  %v1923_v18 = vld [vmem:[#allocation3 + $0xec] ss:$28 sps:$4 sm:$0xff]   ;;  %v1926_v20 = vld [vmem:[#allocation3 + $0x11c] ss:$28 sps:$4 sm:$0xff]  }
  0x1c   :  { %1160 = vmatprep.subr.bf16.mxu0 %v1908_v9  ;;  %1246 = vmatprep.subr.bf16.mxu1 %v1911_v11  ;;  %v1925_v21 = vld [vmem:[#allocation3 + $0xe8] ss:$28 sps:$4 sm:$0xff]   ;;  %v1928_v23 = vld [vmem:[#allocation3 + $0x118] ss:$28 sps:$4 sm:$0xff]   ;;  %v1931_v25 = vld [vmem:[#allocation3 + $0x120] ss:$28 sps:$4 sm:$0xff]  }
  0x1d   :  { %v1929_v22 = vld [vmem:[#allocation3 + $0x124] ss:$28 sps:$4 sm:$0xff]   ;;  %v1932_v24 = vld [vmem:[#allocation3 + $0x154] ss:$28 sps:$4 sm:$0xff]   ;;  %v1935_v26 = vld [vmem:[#allocation3 + $0x15c] ss:$28 sps:$4 sm:$0xff]  }
  0x1e   :  { %v1934_v27 = vld [vmem:[#allocation3 + $0x150] ss:$28 sps:$4 sm:$0xff]   ;;  %v1937_v29 = vld [vmem:[#allocation3 + $0x158] ss:$28 sps:$4 sm:$0xff]   ;;  %v1940_v31 = vld [vmem:[#allocation3 + $0x188] ss:$28 sps:$4 sm:$0xff]  }
  0x1f   :  { %1161 = vmatpush1.bf16.msra.mxu0 %v1910_v10  ;;  %1247 = vmatpush1.bf16.msra.mxu1 %v1913_v13  ;;  %v1938_v28 = vld [vmem:[#allocation3 + $0x18c] ss:$28 sps:$4 sm:$0xff]   ;;  %v1941_v30 = vld [vmem:[#allocation3 + $0x194] ss:$28 sps:$4 sm:$0xff]   ;;  %v1944_v32 = vld [vmem:[#allocation3 + $0x1c4] ss:$28 sps:$4 sm:$0xff]  }
  0x20   :  { %1162 = vmatprep.subr.bf16.mxu0 %v1914_v12  ;;  %1248 = vmatprep.subr.bf16.mxu1 %v1917_v14  ;;  %v1943_v33 = vld [vmem:[#allocation3 + $0x190] ss:$28 sps:$4 sm:$0xff]   ;;  %v1946_v35 = vld [vmem:[#allocation3 + $0x1c0] ss:$28 sps:$4 sm:$0xff]   ;;  %v1949_v37 = vld [vmem:[#allocation3 + $0x1c8] ss:$28 sps:$4 sm:$0xff]  }
  0x21   :  { %v1947_v34 = vld [vmem:[#allocation3 + $0x1cc] ss:$28 sps:$4 sm:$0xff]   ;;  %v1950_v36 = vld [vmem:[#allocation3 + $0x1fc] ss:$28 sps:$4 sm:$0xff]   ;;  %v1953_v38 = vld [vmem:[#allocation3 + $0x204] ss:$28 sps:$4 sm:$0xff]  }
  0x22   :  { %v1952_v39 = vld [vmem:[#allocation3 + $0x1f8] ss:$28 sps:$4 sm:$0xff]   ;;  %v1955_v41 = vld [vmem:[#allocation3 + $0x200] ss:$28 sps:$4 sm:$0xff]   ;;  %v1958_v43 = vld [vmem:[#allocation3 + $0x230] ss:$28 sps:$4 sm:$0xff]  }
  0x23   :  { %1163 = vmatpush1.bf16.msra.mxu0 %v1916_v15  ;;  %1249 = vmatpush1.bf16.msra.mxu1 %v1919_v17  ;;  %v1956_v40 = vld [vmem:[#allocation3 + $0x234] ss:$28 sps:$4 sm:$0xff]   ;;  %v1959_v42 = vld [vmem:[#allocation3 + $0x23c] ss:$28 sps:$4 sm:$0xff]   ;;  %v1962_v44 = vld [vmem:[#allocation3 + $0x26c] ss:$28 sps:$4 sm:$0xff]  }
  0x24   :  { %1164 = vmatprep.subr.bf16.mxu0 %v1920_v16  ;;  %1250 = vmatprep.subr.bf16.mxu1 %v1923_v18  ;;  %v1961_v45 = vld [vmem:[#allocation3 + $0x238] ss:$28 sps:$4 sm:$0xff]   ;;  %v1964_v46 = vld [vmem:[#allocation3 + $0x268] ss:$28 sps:$4 sm:$0xff]   ;;  %v1967_v50 = vld [vmem:[#allocation3 + $0x270] ss:$28 sps:$4 sm:$0xff]  }
  0x25   :  { %v1965_v47 = vld [vmem:[#allocation3 + $0x274] ss:$28 sps:$4 sm:$0xff]   ;;  %v1968_v49 = vld [vmem:[#allocation3 + $0x2a4] ss:$28 sps:$4 sm:$0xff]   ;;  %v1971_v51 = vld [vmem:[#allocation3 + $0x2ac] ss:$28 sps:$4 sm:$0xff]  }
  0x26   :  { %v2228_v48 = vld [vmem:[%s2300_s0 + $0x4] ss:$12 sps:$4 sm:$0xff]   ;;  %v1974_v53 = vld [vmem:[#allocation3 + $0x2dc] ss:$28 sps:$4 sm:$0xff]   ;;  %v2167_v10 = vmov 0   ;;  %vm2169_vm0 = vmmov 0  }
  0x27   :  { %1165 = vmatpush1.bf16.msra.mxu0 %v1922_v19  ;;  %1251 = vmatpush1.bf16.msra.mxu1 %v1925_v21  ;;  %v1970_v52 = vld [vmem:[#allocation3 + $0x2a0] ss:$28 sps:$4 sm:$0xff]   ;;  %v1973_v54 = vld [vmem:[#allocation3 + $0x2a8] ss:$28 sps:$4 sm:$0xff]   ;;  %v1976_v56 = vld [vmem:[#allocation3 + $0x2d8] ss:$28 sps:$4 sm:$0xff]  }
  0x28   :  { %1166 = vmatprep.subr.bf16.mxu0 %v1926_v20  ;;  %1252 = vmatprep.subr.bf16.mxu1 %v1929_v22  ;;  %v1977_v55 = vld [vmem:[#allocation3 + $0x2e4] ss:$28 sps:$4 sm:$0xff]   ;;  %v1980_v57 = vld [vmem:[#allocation3 + $0x314] ss:$28 sps:$4 sm:$0xff]   ;;  %v1983_v59 = vld [vmem:[#allocation3 + $0x31c] ss:$28 sps:$4 sm:$0xff]  }
  0x29   :  { %1188 = vmatprep.mubr.bf16.mxu0 %v2228_v48  ;;  %1274 = vmatprep.mubr.bf16.mxu1 %v2228_v48  ;;  %v1979_v58 = vld [vmem:[#allocation3 + $0x2e0] ss:$28 sps:$4 sm:$0xff]   ;;  %v1982_v60 = vld [vmem:[#allocation3 + $0x310] ss:$28 sps:$4 sm:$0xff]   ;;  %v1985_v62 = vld [vmem:[#allocation3 + $0x318] ss:$28 sps:$4 sm:$0xff]  }
  0x2a   :  { %v1986_v61 = vld [vmem:[#allocation3 + $0x34c] ss:$28 sps:$4 sm:$0xff]   ;;  %v1989_v63 = vld [vmem:[#allocation3 + $0x354] ss:$28 sps:$4 sm:$0xff]   ;;  %v1996_v1 = vld [vmem:[#allocation3 + $0x384] ss:$28 sps:$4 sm:$0xff]  }
  0x2b   :  { %1167 = vmatpush1.bf16.msra.mxu0 %v1928_v23  ;;  %1253 = vmatpush1.bf16.msra.mxu1 %v1931_v25  ;;  %v1988_v0 = vld [vmem:[#allocation3 + $0x348] ss:$28 sps:$4 sm:$0xff]   ;;  %v1991_v2 = vld [vmem:[#allocation3 + $0x350] ss:$28 sps:$4 sm:$0xff]   ;;  %v1994_v5 = vld [vmem:[#allocation3 + $0x380] ss:$28 sps:$4 sm:$0xff]  }
  0x2c   :  { %1168 = vmatprep.subr.bf16.mxu0 %v1932_v24  ;;  %1254 = vmatprep.subr.bf16.mxu1 %v1935_v26  ;;  %v2235_v3 = vld [vmem:[%s2300_s0] ss:$12 sps:$4 sm:$0xff]   ;;  %v2001_v9 = vld [vmem:[#allocation3 + $0x3b8] ss:$28 sps:$4 sm:$0xff]   ;;  %vm1635_vm1 = vcmask 122880  }
  0x2d   :  { %v2000_v4 = vld [vmem:[#allocation3 + $0x38c] ss:$28 sps:$4 sm:$0xff]   ;;  %v2003_v6 = vld [vmem:[#allocation3 + $0x3bc] ss:$28 sps:$4 sm:$0xff]   ;;  %v2006_v8 = vld [vmem:[#allocation3 + $0x3c4] ss:$28 sps:$4 sm:$0xff]  }
  0x2e   :  { %v1998_v7 = vld [vmem:[#allocation3 + $0x388] ss:$28 sps:$4 sm:$0xff]   ;;  %v2009_v11 = vld [vmem:[#allocation3 + $0x3f4] ss:$28 sps:$4 sm:$0xff]   ;;  %v2004_v12 = vld [vmem:[#allocation3 + $0x3c0] ss:$28 sps:$4 sm:$0xff]  }
  0x2f   :  { %1169 = vmatpush1.bf16.msra.mxu0 %v1934_v27  ;;  %1255 = vmatpush1.bf16.msra.mxu1 %v1937_v29  ;;  %v2012_v13 = vld [vmem:[#allocation3 + $0x3fc] ss:$28 sps:$4 sm:$0xff]   ;;  %v2007_v14 = vld [vmem:[#allocation3 + $0x3f0] ss:$28 sps:$4 sm:$0xff]   ;;  %v2013_v18 = vld [vmem:[#allocation3 + $0x428] ss:$28 sps:$4 sm:$0xff]  }
  0x30   :  { %1170 = vmatprep.subr.bf16.mxu0 %v1938_v28  ;;  %1256 = vmatprep.subr.bf16.mxu1 %v1941_v30  ;;  %v2015_v15 = vld [vmem:[#allocation3 + $0x42c] ss:$28 sps:$4 sm:$0xff]   ;;  %v2010_v16 = vld [vmem:[#allocation3 + $0x3f8] ss:$28 sps:$4 sm:$0xff]   ;;  %v2021_v19 = vld [vmem:[#allocation3 + $0x464] ss:$28 sps:$4 sm:$0xff]  }
  0x31   :  { %v2018_v17 = vld [vmem:[#allocation3 + $0x434] ss:$28 sps:$4 sm:$0xff]   ;;  %v2024_v21 = vld [vmem:[#allocation3 + $0x46c] ss:$28 sps:$4 sm:$0xff]   ;;  %v2019_v22 = vld [vmem:[#allocation3 + $0x460] ss:$28 sps:$4 sm:$0xff]  }
  0x32   :  { %v2016_v20 = vld [vmem:[#allocation3 + $0x430] ss:$28 sps:$4 sm:$0xff]   ;;  %v2027_v23 = vld [vmem:[#allocation3 + $0x49c] ss:$28 sps:$4 sm:$0xff]   ;;  %v2022_v24 = vld [vmem:[#allocation3 + $0x468] ss:$28 sps:$4 sm:$0xff]  }
  0x33   :  { %1171 = vmatpush1.bf16.msra.mxu0 %v1940_v31  ;;  %1257 = vmatpush1.bf16.msra.mxu1 %v1943_v33  ;;  %v2030_v25 = vld [vmem:[#allocation3 + $0x4a4] ss:$28 sps:$4 sm:$0xff]   ;;  %v2025_v26 = vld [vmem:[#allocation3 + $0x498] ss:$28 sps:$4 sm:$0xff]   ;;  %v2031_v30 = vld [vmem:[#allocation3 + $0x4d0] ss:$28 sps:$4 sm:$0xff]  }
  0x34   :  { %1172 = vmatprep.subr.bf16.mxu0 %v1944_v32  ;;  %1258 = vmatprep.subr.bf16.mxu1 %v1947_v34  ;;  %v2033_v27 = vld [vmem:[#allocation3 + $0x4d4] ss:$28 sps:$4 sm:$0xff]   ;;  %v2028_v28 = vld [vmem:[#allocation3 + $0x4a0] ss:$28 sps:$4 sm:$0xff]   ;;  %v2039_v31 = vld [vmem:[#allocation3 + $0x50c] ss:$28 sps:$4 sm:$0xff]  }
  0x35   :  { %v2036_v29 = vld [vmem:[#allocation3 + $0x4dc] ss:$28 sps:$4 sm:$0xff]   ;;  %v2042_v33 = vld [vmem:[#allocation3 + $0x514] ss:$28 sps:$4 sm:$0xff]   ;;  %v2037_v34 = vld [vmem:[#allocation3 + $0x508] ss:$28 sps:$4 sm:$0xff]  }
  0x36   :  { %v2034_v32 = vld [vmem:[#allocation3 + $0x4d8] ss:$28 sps:$4 sm:$0xff]  }
  0x37   :  { %1173 = vmatpush1.bf16.msra.mxu0 %v1946_v35  ;;  %1259 = vmatpush1.bf16.msra.mxu1 %v1949_v37  ;;  %v2046_v35 = vld [vmem:[#allocation3 + $0x14] ss:$28 sps:$4 sm:$0xff]  }
  0x38   :  { %1174 = vmatprep.subr.bf16.mxu0 %v1950_v36  ;;  %1260 = vmatprep.subr.bf16.mxu1 %v1953_v38  ;;  %v2040_v36 = vld [vmem:[#allocation3 + $0x510] ss:$28 sps:$4 sm:$0xff]   ;;  %v2050_v38 = vld [vmem:[#allocation3 + $0x1d8] ss:$28 sps:$4 sm:$0xff]  }
  0x39   :  { %v2244_v37 = vld [vmem:[%s2300_s0 + $0x8] ss:$12 sps:$4 sm:$0xff]  }
  0x3b   :  { %1175 = vmatpush1.bf16.msra.mxu0 %v1952_v39  ;;  %1261 = vmatpush1.bf16.msra.mxu1 %v1955_v41  ;;  %v2044_v39 = vld [vmem:[#allocation3 + $0x10] ss:$28 sps:$4 sm:$0xff]   ;;  %v2054_v41 = vld [vmem:[#allocation3 + $0x18] ss:$28 sps:$4 sm:$0xff]  }
  0x3c   :  { %1176 = vmatprep.subr.bf16.mxu0 %v1956_v40  ;;  %1262 = vmatprep.subr.bf16.mxu1 %v1959_v42  ;;  %v2049_v40 = vld [vmem:[#allocation3 + $0x4c] ss:$28 sps:$4 sm:$0xff]  }
  0x3d   :  { %v2055_v42 = vld [vmem:[#allocation3 + $0x210] ss:$28 sps:$4 sm:$0xff]  }
  0x3f   :  { %1177 = vmatpush1.bf16.msra.mxu0 %v1958_v43  ;;  %1263 = vmatpush1.bf16.msra.mxu1 %v1961_v45  ;;  %v2047_v43 = vld [vmem:[#allocation3 + $0x48] ss:$28 sps:$4 sm:$0xff]   ;;  %v2059_v45 = vld [vmem:[#allocation3 + $0x50] ss:$28 sps:$4 sm:$0xff]  }
  0x40   :  { %1178 = vmatprep.subr.bf16.mxu0 %v1962_v44  ;;  %1264 = vmatprep.subr.bf16.mxu1 %v1965_v47  ;;  %v2053_v44 = vld [vmem:[#allocation3 + $0x84] ss:$28 sps:$4 sm:$0xff]  }
  0x41   :  { %v2051_v47 = vld [vmem:[#allocation3 + $0x80] ss:$28 sps:$4 sm:$0xff]  }
  0x43   :  { %1179 = vmatpush1.bf16.msra.mxu0 %v1964_v46  ;;  %1265 = vmatpush1.bf16.msra.mxu1 %v1967_v50  ;;  %v2060_v46 = vld [vmem:[#allocation3 + $0x248] ss:$28 sps:$4 sm:$0xff]  }
  0x44   :  { %1180 = vmatprep.subr.bf16.mxu0 %v1968_v49  ;;  %1266 = vmatprep.subr.bf16.mxu1 %v1971_v51  ;;  %v2058_v49 = vld [vmem:[#allocation3 + $0xbc] ss:$28 sps:$4 sm:$0xff]   ;;  %v2064_v50 = vld [vmem:[#allocation3 + $0x88] ss:$28 sps:$4 sm:$0xff]  }
  0x45   :  { %v2065_v51 = vld [vmem:[#allocation3 + $0x280] ss:$28 sps:$4 sm:$0xff]  }
  0x47   :  { %1181 = vmatpush1.bf16.msra.mxu0 %v1970_v52  ;;  %1267 = vmatpush1.bf16.msra.mxu1 %v1973_v54  ;;  %v2056_v52 = vld [vmem:[#allocation3 + $0xb8] ss:$28 sps:$4 sm:$0xff]   ;;  %v2069_v54 = vld [vmem:[#allocation3 + $0xc0] ss:$28 sps:$4 sm:$0xff]  }
  0x48   :  { %1182 = vmatprep.subr.bf16.mxu0 %v1974_v53  ;;  %1268 = vmatprep.subr.bf16.mxu1 %v1977_v55  ;;  %v2063_v53 = vld [vmem:[#allocation3 + $0xf4] ss:$28 sps:$4 sm:$0xff]  }
  0x49   :  { %v2070_v55 = vld [vmem:[#allocation3 + $0x2b8] ss:$28 sps:$4 sm:$0xff]  }
  0x4b   :  { %1183 = vmatpush1.bf16.msra.mxu0 %v1976_v56  ;;  %1269 = vmatpush1.bf16.msra.mxu1 %v1979_v58  ;;  %v2068_v56 = vld [vmem:[#allocation3 + $0x12c] ss:$28 sps:$4 sm:$0xff]  }
  0x4c   :  { %1184 = vmatprep.subr.bf16.mxu0 %v1980_v57  ;;  %1270 = vmatprep.subr.bf16.mxu1 %v1983_v59  ;;  %v2074_v57 = vld [vmem:[#allocation3 + $0xf8] ss:$28 sps:$4 sm:$0xff]   ;;  %v2075_v58 = vld [vmem:[#allocation3 + $0x2f0] ss:$28 sps:$4 sm:$0xff]   ;;  %v2066_v59 = vld [vmem:[#allocation3 + $0x128] ss:$28 sps:$4 sm:$0xff]  }
  0x4f   :  { %1185 = vmatpush1.bf16.msra.mxu0 %v1982_v60  ;;  %1271 = vmatpush1.bf16.msra.mxu1 %v1985_v62  ;;  %v2073_v60 = vld [vmem:[#allocation3 + $0x164] ss:$28 sps:$4 sm:$0xff]  }
  0x50   :  { %1186 = vmatprep.subr.bf16.mxu0 %v1986_v61  ;;  %1272 = vmatprep.subr.bf16.mxu1 %v1989_v63  ;;  %v2079_v61 = vld [vmem:[#allocation3 + $0x130] ss:$28 sps:$4 sm:$0xff]   ;;  %v2080_v62 = vld [vmem:[#allocation3 + $0x328] ss:$28 sps:$4 sm:$0xff]   ;;  %v2071_v63 = vld [vmem:[#allocation3 + $0x160] ss:$28 sps:$4 sm:$0xff]  }
  0x53   :  { %1187 = vmatpush1.bf16.msra.mxu0 %v1988_v0  ;;  %1273 = vmatpush1.bf16.msra.mxu1 %v1991_v2  ;;  %v2078_v0 = vld [vmem:[#allocation3 + $0x19c] ss:$28 sps:$4 sm:$0xff]  }
  0x54   :  { %1199 = vmatprep.subr.bf16.mxu0 %v1996_v1  ;;  %1285 = vmatprep.subr.bf16.mxu1 %v2000_v4  ;;  %v2084_v1 = vld [vmem:[#allocation3 + $0x168] ss:$28 sps:$4 sm:$0xff]   ;;  %v2085_v2 = vld [vmem:[#allocation3 + $0x360] ss:$28 sps:$4 sm:$0xff]   ;;  %v2076_v4 = vld [vmem:[#allocation3 + $0x198] ss:$28 sps:$4 sm:$0xff]  }
  0x56   :  { %1189 = vmatmul.mubr.bf16.vlgmr.msra.gmra.mrb[0].mxu0 %v2235_v3  ;;  %1275 = vmatmul.mubr.bf16.vlgmr.msra.gmra.mrb[0].mxu1 %v2235_v3 }
  0x57   :  { %1200 = vmatpush1.bf16.msra.mxu0 %v1994_v5  ;;  %1231 = vmatprep.mubr.bf16.mxu0 %v2167_v10  ;;  %v2083_v5 = vld [vmem:[#allocation3 + $0x1d4] ss:$28 sps:$4 sm:$0xff]  }
  0x58   :  { %1201 = vmatprep.subr.bf16.mxu0 %v2003_v6  ;;  %1286 = vmatpush1.bf16.msra.mxu1 %v1998_v7  ;;  %v2089_v6 = vld [vmem:[#allocation3 + $0x1a0] ss:$28 sps:$4 sm:$0xff]   ;;  %v2081_v7 = vld [vmem:[#allocation3 + $0x1d0] ss:$28 sps:$4 sm:$0xff]  }
  0x59   :  { %1317 = vmatprep.mubr.bf16.mxu1 %v2167_v10  ;;  %1287 = vmatprep.subr.bf16.mxu1 %v2006_v8  ;;  %v2088_v8 = vld [vmem:[#allocation3 + $0x20c] ss:$28 sps:$4 sm:$0xff]  }
  0x5b   :  { %1202 = vmatpush1.bf16.msra.mxu0 %v2001_v9  ;;  %v2093_v9 = vld [vmem:[#allocation3 + $0x398] ss:$28 sps:$4 sm:$0xff]  }
  0x5c   :  { %1203 = vmatprep.subr.bf16.mxu0 %v2009_v11  ;;  %1288 = vmatpush1.bf16.msra.mxu1 %v2004_v12  ;;  %v2168_v11 = vmov 0.0   ;;  %v2086_v12 = vld [vmem:[#allocation3 + $0x208] ss:$28 sps:$4 sm:$0xff]  }
  0x5d   :  { %1289 = vmatprep.subr.bf16.mxu1 %v2012_v13  ;;  %v2092_v13 = vld [vmem:[#allocation3 + $0x244] ss:$28 sps:$4 sm:$0xff]  }
  0x5f   :  { %1204 = vmatpush1.bf16.msra.mxu0 %v2007_v14  ;;  %v2097_v14 = vld [vmem:[#allocation3 + $0x3d0] ss:$28 sps:$4 sm:$0xff]  }
  0x60   :  { %1205 = vmatprep.subr.bf16.mxu0 %v2015_v15  ;;  %1290 = vmatpush1.bf16.msra.mxu1 %v2010_v16  ;;  %v2090_v15 = vld [vmem:[#allocation3 + $0x240] ss:$28 sps:$4 sm:$0xff]  }
  0x61   :  { %1291 = vmatprep.subr.bf16.mxu1 %v2018_v17  ;;  %v2096_v16 = vld [vmem:[#allocation3 + $0x27c] ss:$28 sps:$4 sm:$0xff]   ;;  %v2101_v17 = vld [vmem:[#allocation3 + $0x408] ss:$28 sps:$4 sm:$0xff]  }
  0x63   :  { %1206 = vmatpush1.bf16.msra.mxu0 %v2013_v18  ;;  %v2094_v18 = vld [vmem:[#allocation3 + $0x278] ss:$28 sps:$4 sm:$0xff]  }
  0x64   :  { %1207 = vmatprep.subr.bf16.mxu0 %v2021_v19  ;;  %1292 = vmatpush1.bf16.msra.mxu1 %v2016_v20  ;;  %v2100_v19 = vld [vmem:[#allocation3 + $0x2b4] ss:$28 sps:$4 sm:$0xff]   ;;  %v2105_v20 = vld [vmem:[#allocation3 + $0x440] ss:$28 sps:$4 sm:$0xff]  }
  0x65   :  { %1293 = vmatprep.subr.bf16.mxu1 %v2024_v21  ;;  %v2098_v21 = vld [vmem:[#allocation3 + $0x2b0] ss:$28 sps:$4 sm:$0xff]  }
  0x67   :  { %1208 = vmatpush1.bf16.msra.mxu0 %v2019_v22  ;;  %v2104_v22 = vld [vmem:[#allocation3 + $0x2ec] ss:$28 sps:$4 sm:$0xff]  }
  0x68   :  { %1209 = vmatprep.subr.bf16.mxu0 %v2027_v23  ;;  %1294 = vmatpush1.bf16.msra.mxu1 %v2022_v24  ;;  %v2109_v23 = vld [vmem:[#allocation3 + $0x478] ss:$28 sps:$4 sm:$0xff]   ;;  %v2102_v24 = vld [vmem:[#allocation3 + $0x2e8] ss:$28 sps:$4 sm:$0xff]  }
  0x69   :  { %1295 = vmatprep.subr.bf16.mxu1 %v2030_v25  ;;  %v2108_v25 = vld [vmem:[#allocation3 + $0x324] ss:$28 sps:$4 sm:$0xff]  }
  0x6b   :  { %1210 = vmatpush1.bf16.msra.mxu0 %v2025_v26  ;;  %v2113_v26 = vld [vmem:[#allocation3 + $0x4b0] ss:$28 sps:$4 sm:$0xff]  }
  0x6c   :  { %1211 = vmatprep.subr.bf16.mxu0 %v2033_v27  ;;  %1296 = vmatpush1.bf16.msra.mxu1 %v2028_v28  ;;  %v2106_v27 = vld [vmem:[#allocation3 + $0x320] ss:$28 sps:$4 sm:$0xff]  }
  0x6d   :  { %1297 = vmatprep.subr.bf16.mxu1 %v2036_v29  ;;  %v2112_v28 = vld [vmem:[#allocation3 + $0x35c] ss:$28 sps:$4 sm:$0xff]   ;;  %v2117_v29 = vld [vmem:[#allocation3 + $0x4e8] ss:$28 sps:$4 sm:$0xff]  }
  0x6f   :  { %1212 = vmatpush1.bf16.msra.mxu0 %v2031_v30  ;;  %v2110_v30 = vld [vmem:[#allocation3 + $0x358] ss:$28 sps:$4 sm:$0xff]  }
  0x70   :  { %1213 = vmatprep.subr.bf16.mxu0 %v2039_v31  ;;  %1298 = vmatpush1.bf16.msra.mxu1 %v2034_v32  ;;  %v2116_v31 = vld [vmem:[#allocation3 + $0x394] ss:$28 sps:$4 sm:$0xff]   ;;  %v2121_v32 = vld [vmem:[#allocation3 + $0x520] ss:$28 sps:$4 sm:$0xff]  }
  0x71   :  { %1299 = vmatprep.subr.bf16.mxu1 %v2042_v33  ;;  %v2114_v33 = vld [vmem:[#allocation3 + $0x390] ss:$28 sps:$4 sm:$0xff]  }
  0x73   :  { %1214 = vmatpush1.bf16.msra.mxu0 %v2037_v34  ;;  %v2120_v34 = vld [vmem:[#allocation3 + $0x3cc] ss:$28 sps:$4 sm:$0xff]  }
  0x74   :  { %1328 = vmatprep.subr.bf16.mxu0 %v2046_v35  ;;  %1300 = vmatpush1.bf16.msra.mxu1 %v2040_v36  ;;  %v2118_v35 = vld [vmem:[#allocation3 + $0x3c8] ss:$28 sps:$4 sm:$0xff]  }
  0x75   :  { %1815 = vmatprep.subr.bf16.mxu1 %v2050_v38  ;;  %v2124_v36 = vld [vmem:[#allocation3 + $0x404] ss:$28 sps:$4 sm:$0xff]  }
  0x76   :  { %1232 = vmatmul.mubr.bf16.vlgmr.msra.gmra.mrb[0].mxu0 %v2244_v37  ;;  %v2122_v38 = vld [vmem:[#allocation3 + $0x400] ss:$28 sps:$4 sm:$0xff]  }
  0x77   :  { %1329 = vmatpush1.bf16.msra.mxu0 %v2044_v39  ;;  %1360 = vmatprep.mubr.bf16.mxu0 %v2228_v48  ;;  %v2127_v39 = vld [vmem:[#allocation3 + $0x43c] ss:$28 sps:$4 sm:$0xff]  }
  0x78   :  { %1318 = vmatmul.mubr.bf16.vlgmr.msra.gmra.mrb[0].mxu1 %v2244_v37  ;;  %1330 = vmatprep.subr.bf16.mxu0 %v2049_v40  ;;  %v2125_v40 = vld [vmem:[#allocation3 + $0x438] ss:$28 sps:$4 sm:$0xff]  }
  0x79   :  { %1816 = vmatpush3.bf16.msra.mxu1 %v2054_v41  ;;  %1446 = vmatprep.mubr.bf16.mxu1 %v2228_v48  ;;  %v2061_v48 = vld [vmem:[#allocation3 + $0xf0] ss:$28 sps:$4 sm:$0xff]  }
  0x7a   :  { %1817 = vmatprep.subr.bf16.mxu1 %v2055_v42  ;;  %v2130_v41 = vld [vmem:[#allocation3 + $0x474] ss:$28 sps:$4 sm:$0xff]  }
  0x7b   :  { %1331 = vmatpush1.bf16.msra.mxu0 %v2047_v43  ;;  %v2128_v42 = vld [vmem:[#allocation3 + $0x470] ss:$28 sps:$4 sm:$0xff]   ;;  %v2131_v43 = vld [vmem:[#allocation3 + $0x4a8] ss:$28 sps:$4 sm:$0xff]  }
  0x7c   :  { %1332 = vmatprep.subr.bf16.mxu0 %v2053_v44  ;;  %v2134_v44 = vld [vmem:[#allocation3 + $0x4e0] ss:$28 sps:$4 sm:$0xff]  }
  0x7d   :  { %1818 = vmatpush3.bf16.msra.mxu1 %v2059_v45  ;;  %v2139_v45 = vld [vmem:[#allocation3 + $0x51c] ss:$28 sps:$4 sm:$0xff]  }
  0x7e   :  { %1819 = vmatprep.subr.bf16.mxu1 %v2060_v46  ;;  %v2137_v46 = vld [vmem:[#allocation3 + $0x518] ss:$28 sps:$4 sm:$0xff]  }
  0x7f   :  { %1333 = vmatpush1.bf16.msra.mxu0 %v2051_v47  ;;  %v241_v47 = vlaneseq }
  0x80   :  { %1334 = vmatprep.subr.bf16.mxu0 %v2058_v49 }
  0x81   :  { %1820 = vmatpush3.bf16.msra.mxu1 %v2064_v50  ;;  %v2255_v49 = vshrl.u32 %v241_v47, 7 }
  0x82   :  { %1821 = vmatprep.subr.bf16.mxu1 %v2065_v51  ;;  %v2261_v51 = vld [vmem:[%s2303_s3] sm:$0xff] }
  0x83   :  { %1335 = vmatpush1.bf16.msra.mxu0 %v2056_v52  ;;  %v243_v50 = vsub.s32 0, %v2255_v49  ;;  %v247_v52 = vsub.s32 1, %v2255_v49 }
  0x84   :  { %1336 = vmatprep.subr.bf16.mxu0 %v2063_v53  ;;  %v251_v53 = vsub.s32 2, %v2255_v49 }
  0x85   :  { %1822 = vmatpush3.bf16.msra.mxu1 %v2069_v54  ;;  %v255_v54 = vsub.s32 3, %v2255_v49 }
  0x86   :  { %1823 = vmatprep.subr.bf16.mxu1 %v2070_v55  ;;  %v244_v55 = vrot.slane %v2261_v51, %v243_v50 }
  0x87   :  { %1337 = vmatpush1.bf16.msra.mxu0 %v2061_v48  ;;  %v248_v48 = vrot.slane %v2261_v51, %v247_v52 }
  0x88   :  { %1338 = vmatprep.subr.bf16.mxu0 %v2068_v56  ;;  %v252_v56 = vrot.slane %v2261_v51, %v251_v53 }
  0x89   :  { %1824 = vmatpush3.bf16.msra.mxu1 %v2074_v57 }
  0x8a   :  { %1825 = vmatprep.subr.bf16.mxu1 %v2075_v58  ;;  %v256_v58 = vrot.slane %v2261_v51, %v255_v54 }
  0x8b   :  { %1339 = vmatpush1.bf16.msra.mxu0 %v2066_v59 }
  0x8c   :  { %1340 = vmatprep.subr.bf16.mxu0 %v2073_v60 }
  0x8d   :  { %1826 = vmatpush3.bf16.msra.mxu1 %v2079_v61 }
  0x8e   :  { %1827 = vmatprep.subr.bf16.mxu1 %v2080_v62 }
  0x8f   :  { %1341 = vmatpush1.bf16.msra.mxu0 %v2071_v63 }
  0x90   :  { %1342 = vmatprep.subr.bf16.mxu0 %v2078_v0 }
  0x91   :  { %1828 = vmatpush3.bf16.msra.mxu1 %v2084_v1 }
  0x92   :  { %1829 = vmatprep.subr.bf16.mxu1 %v2085_v2 }
  0x93   :  { %1343 = vmatpush1.bf16.msra.mxu0 %v2076_v4 }
  0x94   :  { %1344 = vmatprep.subr.bf16.mxu0 %v2083_v5 }
  0x95   :  { %1830 = vmatpush3.bf16.msra.mxu1 %v2089_v6 }
  0x96   :  { %1846 = vmatprep.subr.bf16.mxu1 %v2168_v11 }
  0x97   :  { %1345 = vmatpush1.bf16.msra.mxu0 %v2081_v7 }
  0x98   :  { %1346 = vmatprep.subr.bf16.mxu0 %v2088_v8  ;;  %1447 = vmatmul.mubr.bf16.vlgmr.msra.gmra.mrb[4].mxu1 %v2235_v3 }
  0x99   :  { %1847 = vmatpush3.bf16.msra.mxu1 %v2093_v9  ;;  %1862 = vmatprep.mubr.msk.bf16.mxu1 %vm2169_vm0, %v2168_v11 }
  0x9a   :  { %1848 = vmatprep.subr.bf16.mxu1 %v2168_v11 }
  0x9b   :  { %1347 = vmatpush1.bf16.msra.mxu0 %v2086_v12 }
  0x9c   :  { %1348 = vmatprep.subr.bf16.mxu0 %v2092_v13 }
  0x9d   :  { %1849 = vmatpush3.bf16.msra.mxu1 %v2097_v14 }
  0x9e   :  { %1850 = vmatprep.subr.bf16.mxu1 %v2168_v11 }
  0x9f   :  { %1349 = vmatpush1.bf16.msra.mxu0 %v2090_v15 }
  0xa0   :  { %1350 = vmatprep.subr.bf16.mxu0 %v2096_v16 }
  0xa1   :  { %1851 = vmatpush3.bf16.msra.mxu1 %v2101_v17 }
  0xa2   :  { %1852 = vmatprep.subr.bf16.mxu1 %v2168_v11 }
  0xa3   :  { %1351 = vmatpush1.bf16.msra.mxu0 %v2094_v18 }
  0xa4   :  { %1352 = vmatprep.subr.bf16.mxu0 %v2100_v19 }
  0xa5   :  { %1853 = vmatpush3.bf16.msra.mxu1 %v2105_v20 }
  0xa6   :  { %1854 = vmatprep.subr.bf16.mxu1 %v2168_v11 }
  0xa7   :  { %1353 = vmatpush1.bf16.msra.mxu0 %v2098_v21 }
  0xa8   :  { %1354 = vmatprep.subr.bf16.mxu0 %v2104_v22 }
  0xa9   :  { %1855 = vmatpush3.bf16.msra.mxu1 %v2109_v23 }
  0xaa   :  { %1856 = vmatprep.subr.bf16.mxu1 %v2168_v11 }
  0xab   :  { %1355 = vmatpush1.bf16.msra.mxu0 %v2102_v24 }
  0xac   :  { %1356 = vmatprep.subr.bf16.mxu0 %v2108_v25 }
  0xad   :  { %1857 = vmatpush3.bf16.msra.mxu1 %v2113_v26 }
  0xae   :  { %1858 = vmatprep.subr.bf16.mxu1 %v2168_v11 }
  0xaf   :  { %1357 = vmatpush1.bf16.msra.mxu0 %v2106_v27 }
  0xb0   :  { %1358 = vmatprep.subr.bf16.mxu0 %v2112_v28 }
  0xb1   :  { %1859 = vmatpush3.bf16.msra.mxu1 %v2117_v29 }
  0xb2   :  { %1860 = vmatprep.subr.bf16.mxu1 %v2168_v11 }
  0xb3   :  { %1359 = vmatpush1.bf16.msra.mxu0 %v2110_v30 }
  0xb4   :  { %1371 = vmatprep.subr.bf16.mxu0 %v2116_v31 }
  0xb5   :  { %1861 = vmatpush3.bf16.msra.mxu1 %v2121_v32 }
  0xb6   :  { %1361 = vmatmul.mubr.bf16.vlgmr.msra.gmra.mrb[4].mxu0 %v2235_v3  ;;  %v2133_v3 = vld [vmem:[#allocation3 + $0x4ac] ss:$28 sps:$4 sm:$0xff]  }
  0xb7   :  { %1372 = vmatpush1.bf16.msra.mxu0 %v2114_v33  ;;  %1403 = vmatprep.mubr.bf16.mxu0 %v2167_v10  ;;  %v2136_v10 = vld [vmem:[#allocation3 + $0x4e4] ss:$28 sps:$4 sm:$0xff]  }
  0xb8   :  { %1373 = vmatprep.subr.bf16.mxu0 %v2120_v34  ;;  %1863 = vmatmul.mubr.bf16.vlgmr.msra.gmra.mrb[8].mxu1 %v2244_v37 }
  0xbb   :  { %1374 = vmatpush1.bf16.msra.mxu0 %v2118_v35 }
  0xbc   :  { %1375 = vmatprep.subr.bf16.mxu0 %v2124_v36 }
  0xbf   :  { %1376 = vmatpush1.bf16.msra.mxu0 %v2122_v38 }
  0xc0   :  { %1377 = vmatprep.subr.bf16.mxu0 %v2127_v39 }
  0xc3   :  { %1378 = vmatpush1.bf16.msra.mxu0 %v2125_v40 }
  0xc4   :  { %1379 = vmatprep.subr.bf16.mxu0 %v2130_v41 }
  0xc7   :  { %1380 = vmatpush1.bf16.msra.mxu0 %v2128_v42 }
  0xc8   :  { %1381 = vmatprep.subr.bf16.mxu0 %v2133_v3 }
  0xcb   :  { %1382 = vmatpush1.bf16.msra.mxu0 %v2131_v43 }
  0xcc   :  { %1383 = vmatprep.subr.bf16.mxu0 %v2136_v10  ;;  %v267_v10 = vsub.s32 6, %v2255_v49 }
  0xcf   :  { %1384 = vmatpush1.bf16.msra.mxu0 %v2134_v44  ;;  %v268_v44 = vrot.slane %v2261_v51, %v267_v10 }
  0xd0   :  { %1385 = vmatprep.subr.bf16.mxu0 %v2139_v45 }
  0xd3   :  { %1386 = vmatpush1.bf16.msra.mxu0 %v2137_v46 }
  0xd6   :  { %1404 = vmatmul.mubr.bf16.vlgmr.msra.gmra.mrb[4].mxu0 %v2244_v37  ;;  %v2270_v37 = vld [vmem:[%s2304_s4] sm:$0xff] }
  0xd7   :  { %v1515_v60 = vrot.slane %v2270_v37, %v243_v50  ;;  %v1519_v63 = vrot.slane %v2270_v37, %v247_v52  ;;  %v1523_v6 = vrot.slane %v2270_v37, %v251_v53  ;;  %v1527_v13 = vrot.slane %v2270_v37, %v255_v54 }
 0x149   :  { %v1233_v57 = vpop.f32.mrb[0].mxu0 }
 0x14a   :  { %v1866_v59 = vadd.f32 %v1233_v57, %v244_v55  ;;  %v1235_v61 = vpop.f32.mrb[1].mxu0 }
 0x14b   :  { %v1867_v62 = vadd.f32 %v1235_v61, %v248_v48  ;;  %v1237_v0 = vpop.f32.mrb[2].mxu0  ;;  %v1319_v1 = vpop.f32.mrb[0].mxu1 }
 0x14c   :  { %v1496_v2 = vmax.f32 %v1866_v59, 0.0  ;;  %v1868_v4 = vadd.f32 %v1237_v0, %v244_v55  ;;  %v1870_v5 = vadd.f32 %v1319_v1, %v252_v56  ;;  %v1239_v7 = vpop.f32.mrb[3].mxu0  ;;  %v1321_v8 = vpop.f32.mrb[1].mxu1 }
 0x14d   :  { %v1497_v9 = vmax.f32 %v1867_v62, 0.0  ;;  %v1869_v11 = vadd.f32 %v1239_v7, %v248_v48  ;;  %v1871_v12 = vadd.f32 %v1321_v8, %v256_v58  ;;  %v1323_v14 = vpop.f32.mrb[2].mxu1  ;;  %v259_v48 = vsub.s32 4, %v2255_v49 }
 0x14e   :  { %v1547_v15 = vmul.f32 %v1515_v60, %v1496_v2  ;;  %v1503_v16 = vmax.f32 %v1868_v4, 0.0  ;;  %v1498_v17 = vmax.f32 %v1870_v5, 0.0  ;;  %v1872_v18 = vadd.f32 %v1323_v14, %v252_v56  ;;  %v1325_v19 = vpop.f32.mrb[3].mxu1 }
 0x14f   :  { %v1548_v20 = vmul.f32 %v1519_v63, %v1497_v9  ;;  %v1504_v21 = vmax.f32 %v1869_v11, 0.0  ;;  %v1499_v22 = vmax.f32 %v1871_v12, 0.0  ;;  %v1873_v23 = vadd.f32 %v1325_v19, %v256_v58 }
 0x150   :  { %v1554_v24 = vmul.f32 %v1515_v60, %v1503_v16  ;;  %v1549_v25 = vmul.f32 %v1523_v6, %v1498_v17  ;;  %v1505_v26 = vmax.f32 %v1872_v18, 0.0  ;;  %v263_v56 = vsub.s32 5, %v2255_v49 }
 0x151   :  { %v1561_v27 = vadd.f32 %v1548_v20, %v1547_v15  ;;  %v1555_v28 = vmul.f32 %v1519_v63, %v1504_v21  ;;  %v1550_v29 = vmul.f32 %v1527_v13, %v1499_v22  ;;  %v1506_v30 = vmax.f32 %v1873_v23, 0.0  ;;  %v1577_v20 = vld [vmem:[%s2301_s1] sm:$0xff] }
 0x152   :  { %v1556_v31 = vmul.f32 %v1523_v6, %v1505_v26  ;;  %v260_v57 = vrot.slane %v2261_v51, %v259_v48  ;;  %v264_v58 = vrot.slane %v2261_v51, %v263_v56  ;;  %v1531_v61 = vrot.slane %v2270_v37, %v259_v48  ;;  %v1813_v21 = vld [vmem:[%s2305_s5] ss:$0 sm:$0xff] }
 0x153   :  { %v1562_v32 = vadd.f32 %v1561_v27, %v1549_v25  ;;  %v1569_v33 = vadd.f32 %v1555_v28, %v1554_v24  ;;  %v1557_v36 = vmul.f32 %v1527_v13, %v1506_v30  ;;  %v1535_v0 = vrot.slane %v2270_v37, %v263_v56  ;;  %v1578_v24 = vld [vmem:[%s2301_s1 + $0x8] sm:$0xff] }
 0x154   :  { %v1539_v11 = vrot.slane %v2270_v37, %v267_v10  ;;  %v1586_v26 = vmul.f32 %v1813_v21, %v1577_v20  ;;  %v1587_v27 = vmul.f32 %v1813_v21, %v1578_v24 }
 0x155   :  { %v1563_v34 = vadd.f32 %v1562_v32, %v1550_v29  ;;  %v1570_v35 = vadd.f32 %v1569_v33, %v1556_v31  ;;  %v1814_v31 = vld [vmem:[#allocation2] ss:$0 sm:$0xff] }
 0x157   :  { %v1571_v38 = vadd.f32 %v1570_v35, %v1557_v36 }
 0x16b   :  { %v1831_v39 = vpop.f32.mrb[4].mxu1 }
 0x16c   :  { %v1832_v40 = vpop.f32.mrb[5].mxu1 }
 0x16d   :  { %v1833_v41 = vadd.f32 %v1832_v40, %v1831_v39  ;;  %v1834_v42 = vpop.f32.mrb[6].mxu1 }
 0x16e   :  { %v1835_v3 = vpop.f32.mrb[7].mxu1 }
 0x16f   :  { %v1836_v43 = vadd.f32 %v1835_v3, %v1834_v42  ;;  %v1449_v45 = vadd.f32 %v1833_v41, %v268_v44 }
 0x171   :  { %v1452_v46 = vadd.f32 %v1836_v43, %v268_v44 }
 0x18b   :  { %v1489_v47 = vpop.f32.mrb[8].mxu1 }
 0x18c   :  { %v1490_v50 = vadd.f32 %v1489_v47, %v1449_v45  ;;  %v1864_v52 = vpop.f32.mrb[9].mxu1 }
 0x18d   :  { %v1492_v53 = vpop.f32.mrb[10].mxu1 }
 0x18e   :  { %v1493_v54 = vadd.f32 %v1492_v53, %v1452_v46  ;;  %v1865_v55 = vpop.f32.mrb[11].mxu1  ;;  %v1502_v8 = vmax.f32 %v1490_v50, 0.0 }
 0x190   :  { %v1509_v13 = vmax.f32 %v1493_v54, 0.0  ;;  %v1553_v17 = vmul.f32 %v1539_v11, %v1502_v8 }
 0x192   :  { %v1560_v23 = vmul.f32 %v1539_v11, %v1509_v13 }
 0x1a9   :  { %v1405_v59 = vpop.f32.mrb[4].mxu0 }
 0x1aa   :  { %v1874_v60 = vadd.f32 %v1405_v59, %v260_v57  ;;  %v1407_v62 = vpop.f32.mrb[5].mxu0 }
 0x1ab   :  { %v1875_v63 = vadd.f32 %v1407_v62, %v264_v58  ;;  %v1409_v1 = vpop.f32.mrb[6].mxu0 }
 0x1ac   :  { %v1500_v2 = vmax.f32 %v1874_v60, 0.0  ;;  %v1876_v4 = vadd.f32 %v1409_v1, %v260_v57  ;;  %v1411_v5 = vpop.f32.mrb[7].mxu0 }
 0x1ad   :  { %v1501_v6 = vmax.f32 %v1875_v63, 0.0  ;;  %v1877_v7 = vadd.f32 %v1411_v5, %v264_v58 }
 0x1ae   :  { %v1551_v49 = vmul.f32 %v1531_v61, %v1500_v2  ;;  %v1507_v9 = vmax.f32 %v1876_v4, 0.0 }
 0x1af   :  { %v1552_v51 = vmul.f32 %v1535_v0, %v1501_v6  ;;  %v1508_v12 = vmax.f32 %v1877_v7, 0.0 }
 0x1b0   :  { %v1558_v14 = vmul.f32 %v1531_v61, %v1507_v9  ;;  %v1564_v15 = vadd.f32 %v1563_v34, %v1551_v49 }
 0x1b1   :  { %v1559_v16 = vmul.f32 %v1535_v0, %v1508_v12 }
 0x1b2   :  { %v1565_v18 = vadd.f32 %v1564_v15, %v1552_v51  ;;  %v1572_v19 = vadd.f32 %v1571_v38, %v1558_v14 }
 0x1b4   :  { %v1566_v22 = vadd.f32 %v1565_v18, %v1553_v17  ;;  %v1573_v37 = vadd.f32 %v1572_v19, %v1559_v16 }
 0x1b6   :  { %1567 = vadd.xlane.f32.xlu0 %v1566_v22  ;;  %v1574_v25 = vadd.f32 %v1573_v37, %v1560_v23 }
 0x1b8   :  { %1575 = vadd.xlane.f32.xlu1 %v1574_v25 }
 0x1ba   :  { %1588 = vadd.xlane.f32.xlu0 %v1586_v26 }
 0x1bc   :  { %1590 = vadd.xlane.f32.xlu1 %v1587_v27 }
 0x243   :  { %v1568_v28 = vpop.xlane.xlu0 %1567 }
 0x245   :  { %v1576_v29 = vpop.xlane.xlu1 %1575 }
 0x247   :  { %v1589_v30 = vpop.xlane.xlu0 %1588 }
 0x248   :  { %v1592_v32 = vadd.f32 %v1589_v30, %v1568_v28 }
 0x249   :  { %v1591_v33 = vpop.xlane.xlu1 %1590 }
 0x24a   :  { %v1593_v34 = vadd.f32 %v1591_v33, %v1576_v29  ;;  %v1601_v35 = vadd.f32 %v1814_v31, %v1592_v32 }
 0x24c   :  { %1603 = vxpose.xlu0.b32.start [1/2] (short) (narrow) %v1601_v35, 8  ;;  %v1602_v36 = vadd.f32 %v1814_v31, %v1593_v34 }
 0x250   :  { %1604 = vxpose.xlu0.b32.end [2/2] (short) (narrow) %v1602_v36, 8 }
 0x2cc   :  { %v1619_v38 = vpop.trf.xlu0 }
 0x2cd   :  { %1636 = vst.msk [vmem:[%s2307_s7] sm:$0x1] %vm1635_vm1, %v1619_v38 }
 0x2ce   :  { %1641 = vsyncpa [#allocation4], 1 }

</bundles_post_ra>
